<compile_context>
chip_gen: v6e
topology: v6e:2x2x1
jax: 0.10.0
libtpu: 0.0.40
codegen_flags: <defaults>
</compile_context>

<pallas_src>
import jax
import jax.numpy as jnp
from jax.experimental import pallas as pl
from jax.experimental.pallas import tpu as pltpu


def qmix_kernel(q_ref, s_ref, wf_ref, bf_ref, w2b_ref, b2b_ref, out_ref):
    A = q_ref.shape[0]          # n_agents
    H = w2b_ref.shape[0]        # qmix_hidden_dim

    q = q_ref[...]              # (A, T)   f32
    s = s_ref[...]              # (S, T)

    # One fused hypernetwork matmul: (A*H + 3H, S) @ (S, T) -> (A*H + 3H, T).
    z = jnp.dot(wf_ref[...], s, preferred_element_type=jnp.float32) + bf_ref[...]

    # Aligned sublane slices (offsets are multiples of 32 rows -> free).
    w1 = jnp.abs(z[0:A * H, :])                               # (A*H, T)
    b1 = z[A * H:A * H + H, :]                                # (H, T)
    w2 = jnp.abs(z[A * H + H:A * H + 2 * H, :])               # (H, T)
    h2 = jnp.maximum(z[A * H + 2 * H:A * H + 3 * H, :], 0.0)  # (H, T)

    # Mixing layer 1: hidden[h, t] = sum_a q[a, t] * w1[a*H + h, t] + b1[h, t].
    # A is tiny and static -> unrolled; slices of w1 are sublane-aligned.
    mixed = b1
    for a in range(A):
        mixed = mixed + q[a:a + 1, :] * w1[a * H:(a + 1) * H, :]

    # ELU(alpha=1); clamp before exp so the positive branch can't overflow.
    q_hidden = jnp.where(mixed > 0.0,
                         mixed,
                         jnp.exp(jnp.minimum(mixed, 0.0)) - 1.0)   # (H, T)

    # Mixing layer 2 fused with hyper_b2's second Linear:
    #   q_total[t] = sum_h q_hidden[h,t]*w2[h,t] + sum_h h2[h,t]*w2b[h] + b2b
    q_total = jnp.sum(q_hidden * w2 + h2 * w2b_ref[...], axis=0, keepdims=True)
    out_ref[...] = q_total + b2b_ref[...]                          # (1, T) lane-dense


def qmix_forward(q, s, params, *, n_agents, state_shape, qmix_hidden_dim,
                 batch_size, tile_b=512, compute_dtype=jnp.float32):
    """q: (batch_size, ep_len, n_agents), s: (batch_size, ep_len, state_shape).

    compute_dtype controls the dtype fed to the MXU matmul (e.g. jnp.bfloat16);
    all elementwise math stays in f32 (accumulated via preferred_element_type).
    """
    A, S, H = n_agents, state_shape, qmix_hidden_dim
    B = q.shape[0] * q.shape[1]

    # Transposed layout: batch on lanes.
    q_t = q.reshape(B, A).T.astype(jnp.float32)        # (A, B)  - elementwise only
    s_t = s.reshape(B, S).T.astype(compute_dtype)       # (S, B)  - MXU input

    # Fuse the four state-conditioned Linear layers along their output dim.
    # PyTorch (out, in) layout matches the transposed kernel directly.
    w_fused = jnp.concatenate(
        [params["hyper_w1_w"], params["hyper_b1_w"],
         params["hyper_w2_w"], params["hyper_b2_0_w"]], axis=0
    ).astype(compute_dtype)                                        # (A*H+3H, S)
    b_fused = jnp.concatenate(
        [params["hyper_w1_b"], params["hyper_b1_b"],
         params["hyper_w2_b"], params["hyper_b2_0_b"]], axis=0
    ).reshape(-1, 1).astype(jnp.float32)                           # (A*H+3H, 1)
    w2b = params["hyper_b2_2_w"].reshape(H, 1).astype(jnp.float32)  # (H, 1)
    b2b = params["hyper_b2_2_b"].reshape(1, 1).astype(jnp.float32)  # (1, 1)

    # Pick a lane tile (multiple of 128) and zero-pad B up to a multiple of it.
    b_lanes = pl.cdiv(B, 128) * 128
    tile = max(128, (min(tile_b, b_lanes) // 128) * 128)
    bp = pl.cdiv(B, tile) * tile
    if bp != B:
        q_t = jnp.pad(q_t, ((0, 0), (0, bp - B)))
        s_t = jnp.pad(s_t, ((0, 0), (0, bp - B)))

    out = pl.pallas_call(
        qmix_kernel,
        out_shape=jax.ShapeDtypeStruct((1, bp), jnp.float32),
        grid=(bp // tile,),
        in_specs=[
            pl.BlockSpec((A, tile), lambda i: (0, i)),
            pl.BlockSpec((S, tile), lambda i: (0, i)),
            pl.BlockSpec(w_fused.shape, lambda i: (0, 0)),
            pl.BlockSpec(b_fused.shape, lambda i: (0, 0)),
            pl.BlockSpec(w2b.shape, lambda i: (0, 0)),
            pl.BlockSpec(b2b.shape, lambda i: (0, 0)),
        ],
        out_specs=pl.BlockSpec((1, tile), lambda i: (0, i)),
        compiler_params=pltpu.CompilerParams(
            dimension_semantics=("parallel",)),
    )(q_t, s_t, w_fused, b_fused, w2b, b2b)

    return out[0, :B].reshape(batch_size, -1, 1)


def init_params(key, n_agents, state_shape, qmix_hidden_dim):
    """Synthetic hypernet parameters in PyTorch Linear layout (out, in)."""
    A, S, H = n_agents, state_shape, qmix_hidden_dim
    ks = jax.random.split(key, 10)
    sc = 0.1
    n = jax.random.normal
    return {
        "hyper_w1_w":   sc * n(ks[0], (A * H, S), jnp.float32),
        "hyper_w1_b":   sc * n(ks[1], (A * H,), jnp.float32),
        "hyper_b1_w":   sc * n(ks[2], (H, S), jnp.float32),
        "hyper_b1_b":   sc * n(ks[3], (H,), jnp.float32),
        "hyper_w2_w":   sc * n(ks[4], (H, S), jnp.float32),
        "hyper_w2_b":   sc * n(ks[5], (H,), jnp.float32),
        "hyper_b2_0_w": sc * n(ks[6], (H, S), jnp.float32),
        "hyper_b2_0_b": sc * n(ks[7], (H,), jnp.float32),
        "hyper_b2_2_w": sc * n(ks[8], (1, H), jnp.float32),
        "hyper_b2_2_b": sc * n(ks[9], (1,), jnp.float32),
    }


def qmix_reference(q, s, params, *, n_agents, state_shape, qmix_hidden_dim,
                   batch_size):
    """Pure-JAX reference mirroring the PyTorch forward."""
    B = q.shape[0] * q.shape[1]
    qf = q.reshape(B, 1, n_agents)
    sf = s.reshape(B, state_shape)
    w1 = jnp.abs(sf @ params["hyper_w1_w"].T + params["hyper_w1_b"]).reshape(
        B, n_agents, qmix_hidden_dim)
    b1 = (sf @ params["hyper_b1_w"].T + params["hyper_b1_b"]).reshape(
        B, 1, qmix_hidden_dim)
    q_hidden = jax.nn.elu(jnp.matmul(qf, w1) + b1)
    w2 = jnp.abs(sf @ params["hyper_w2_w"].T + params["hyper_w2_b"]).reshape(
        B, qmix_hidden_dim, 1)
    h2 = jax.nn.relu(sf @ params["hyper_b2_0_w"].T + params["hyper_b2_0_b"])
    b2 = (h2 @ params["hyper_b2_2_w"].T + params["hyper_b2_2_b"]).reshape(B, 1, 1)
    q_total = jnp.matmul(q_hidden, w2) + b2
    return q_total.reshape(batch_size, -1, 1)


if __name__ == "__main__":
    # Small shapes consistent with QMIX: 2 episodes, 8 timesteps each.
    batch_size = 2
    ep_len = 8
    n_agents = 4
    state_shape = 32
    qmix_hidden_dim = 32

    key = jax.random.PRNGKey(0)
    kq, ks, kp = jax.random.split(key, 3)
    q = jax.random.normal(kq, (batch_size, ep_len, n_agents), jnp.float32)
    s = jax.random.normal(ks, (batch_size, ep_len, state_shape), jnp.float32)
    params = init_params(kp, n_agents, state_shape, qmix_hidden_dim)

    kwargs = dict(n_agents=n_agents, state_shape=state_shape,
                  qmix_hidden_dim=qmix_hidden_dim, batch_size=batch_size)

    out = qmix_forward(q, s, params, **kwargs)
    out = jax.block_until_ready(out)

    ref = qmix_reference(q, s, params, **kwargs)
    assert out.shape == (batch_size, ep_len, 1), out.shape
    assert jnp.allclose(out, ref, atol=1e-4, rtol=1e-4), (
        float(jnp.max(jnp.abs(out - ref))))

    print("KERNEL_OK")
</pallas_src>

<mosaic_0001>
module attributes {stable_mosaic.version = 11 : i64} {
  func.func @qmix_kernel(%arg0: i32, %arg1: memref<4x128xf32, #tpu.memory_space<vmem>>, %arg2: memref<32x128xf32, #tpu.memory_space<vmem>>, %arg3: memref<224x32xf32, #tpu.memory_space<vmem>>, %arg4: memref<224x1xf32, #tpu.memory_space<vmem>>, %arg5: memref<32x1xf32, #tpu.memory_space<vmem>>, %arg6: memref<1x1xf32, #tpu.memory_space<vmem>>, %arg7: memref<1x128xf32, #tpu.memory_space<vmem>>) attributes {dimension_semantics = [#tpu.dimension_semantics<parallel>], iteration_bounds = array<i64: 1>, scalar_prefetch = 0 : i64, scratch_operands = 0 : i64, tpu.core_type = #tpu.core_type<tc>, window_params = [{transform_indices = @transform_0, window_bounds = array<i64: 4, 128>}, {transform_indices = @transform_1, window_bounds = array<i64: 32, 128>}, {pipeline_mode = #tpu.pipeline_mode<synchronous>, transform_indices = @transform_2, window_bounds = array<i64: 224, 32>}, {pipeline_mode = #tpu.pipeline_mode<synchronous>, transform_indices = @transform_3, window_bounds = array<i64: 224, 1>}, {pipeline_mode = #tpu.pipeline_mode<synchronous>, transform_indices = @transform_4, window_bounds = array<i64: 32, 1>}, {pipeline_mode = #tpu.pipeline_mode<synchronous>, transform_indices = @transform_5, window_bounds = array<i64: 1, 1>}, {transform_indices = @transform_6, window_bounds = array<i64: 1, 128>}]} {
    %c0 = arith.constant 0 : index
    %c0_0 = arith.constant 0 : index
    %0 = vector.load %arg1[%c0, %c0_0] : memref<4x128xf32, #tpu.memory_space<vmem>>, vector<4x128xf32>
    %c0_1 = arith.constant 0 : index
    %c0_2 = arith.constant 0 : index
    %1 = vector.load %arg2[%c0_1, %c0_2] : memref<32x128xf32, #tpu.memory_space<vmem>>, vector<32x128xf32>
    %c0_3 = arith.constant 0 : index
    %c0_4 = arith.constant 0 : index
    %2 = vector.load %arg3[%c0_3, %c0_4] : memref<224x32xf32, #tpu.memory_space<vmem>>, vector<224x32xf32>
    %cst = arith.constant dense<0.000000e+00> : vector<224x128xf32>
    %3 = tpu.matmul %2, %1, %cst {dimension_numbers = #tpu.dot_dimension_numbers<[1], [0], [0], [1], [0, 0, 1, 1], [], []>} : vector<224x32xf32>, vector<32x128xf32>, vector<224x128xf32> -> vector<224x128xf32>
    %c0_5 = arith.constant 0 : index
    %c0_6 = arith.constant 0 : index
    %4 = vector.load %arg4[%c0_5, %c0_6] : memref<224x1xf32, #tpu.memory_space<vmem>>, vector<224x1xf32>
    %5 = vector.broadcast %4 : vector<224x1xf32> to vector<224x128xf32>
    %6 = arith.addf %3, %5 : vector<224x128xf32>
    %7 = vector.extract_strided_slice %6 {offsets = [0, 0], sizes = [128, 128], strides = [1, 1]} : vector<224x128xf32> to vector<128x128xf32>
    %8 = math.absf %7 : vector<128x128xf32>
    %9 = vector.extract_strided_slice %6 {offsets = [128, 0], sizes = [32, 128], strides = [1, 1]} : vector<224x128xf32> to vector<32x128xf32>
    %10 = vector.extract_strided_slice %6 {offsets = [160, 0], sizes = [32, 128], strides = [1, 1]} : vector<224x128xf32> to vector<32x128xf32>
    %11 = math.absf %10 : vector<32x128xf32>
    %12 = vector.extract_strided_slice %6 {offsets = [192, 0], sizes = [32, 128], strides = [1, 1]} : vector<224x128xf32> to vector<32x128xf32>
    %cst_7 = arith.constant 0.000000e+00 : f32
    %13 = vector.broadcast %cst_7 : f32 to vector<32x128xf32>
    %14 = arith.maximumf %12, %13 : vector<32x128xf32>
    %15 = vector.extract_strided_slice %0 {offsets = [0, 0], sizes = [1, 128], strides = [1, 1]} : vector<4x128xf32> to vector<1x128xf32>
    %16 = vector.extract_strided_slice %8 {offsets = [0, 0], sizes = [32, 128], strides = [1, 1]} : vector<128x128xf32> to vector<32x128xf32>
    %17 = vector.broadcast %15 : vector<1x128xf32> to vector<32x128xf32>
    %18 = arith.mulf %17, %16 : vector<32x128xf32>
    %19 = arith.addf %9, %18 : vector<32x128xf32>
    %20 = vector.extract_strided_slice %0 {offsets = [1, 0], sizes = [1, 128], strides = [1, 1]} : vector<4x128xf32> to vector<1x128xf32>
    %21 = vector.extract_strided_slice %8 {offsets = [32, 0], sizes = [32, 128], strides = [1, 1]} : vector<128x128xf32> to vector<32x128xf32>
    %22 = vector.broadcast %20 : vector<1x128xf32> to vector<32x128xf32>
    %23 = arith.mulf %22, %21 : vector<32x128xf32>
    %24 = arith.addf %19, %23 : vector<32x128xf32>
    %25 = vector.extract_strided_slice %0 {offsets = [2, 0], sizes = [1, 128], strides = [1, 1]} : vector<4x128xf32> to vector<1x128xf32>
    %26 = vector.extract_strided_slice %8 {offsets = [64, 0], sizes = [32, 128], strides = [1, 1]} : vector<128x128xf32> to vector<32x128xf32>
    %27 = vector.broadcast %25 : vector<1x128xf32> to vector<32x128xf32>
    %28 = arith.mulf %27, %26 : vector<32x128xf32>
    %29 = arith.addf %24, %28 : vector<32x128xf32>
    %30 = vector.extract_strided_slice %0 {offsets = [3, 0], sizes = [1, 128], strides = [1, 1]} : vector<4x128xf32> to vector<1x128xf32>
    %31 = vector.extract_strided_slice %8 {offsets = [96, 0], sizes = [32, 128], strides = [1, 1]} : vector<128x128xf32> to vector<32x128xf32>
    %32 = vector.broadcast %30 : vector<1x128xf32> to vector<32x128xf32>
    %33 = arith.mulf %32, %31 : vector<32x128xf32>
    %34 = arith.addf %29, %33 : vector<32x128xf32>
    %cst_8 = arith.constant 0.000000e+00 : f32
    %35 = vector.broadcast %cst_8 : f32 to vector<32x128xf32>
    %36 = arith.cmpf ogt, %34, %35 : vector<32x128xf32>
    %cst_9 = arith.constant 0.000000e+00 : f32
    %37 = vector.broadcast %cst_9 : f32 to vector<32x128xf32>
    %38 = arith.minimumf %34, %37 : vector<32x128xf32>
    %39 = math.exp %38 : vector<32x128xf32>
    %cst_10 = arith.constant 1.000000e+00 : f32
    %40 = vector.broadcast %cst_10 : f32 to vector<32x128xf32>
    %41 = arith.subf %39, %40 : vector<32x128xf32>
    %42 = arith.select %36, %34, %41 : vector<32x128xi1>, vector<32x128xf32>
    %43 = arith.mulf %42, %11 : vector<32x128xf32>
    %c0_11 = arith.constant 0 : index
    %c0_12 = arith.constant 0 : index
    %44 = vector.load %arg5[%c0_11, %c0_12] : memref<32x1xf32, #tpu.memory_space<vmem>>, vector<32x1xf32>
    %45 = vector.broadcast %44 : vector<32x1xf32> to vector<32x128xf32>
    %46 = arith.mulf %14, %45 : vector<32x128xf32>
    %47 = arith.addf %43, %46 : vector<32x128xf32>
    %cst_13 = arith.constant dense<0.000000e+00> : vector<128xf32>
    %48 = vector.multi_reduction <add>, %47, %cst_13 [0] : vector<32x128xf32> to vector<128xf32>
    %49 = vector.shape_cast %48 : vector<128xf32> to vector<1x128xf32>
    %c0_14 = arith.constant 0 : index
    %c0_15 = arith.constant 0 : index
    %50 = vector.load %arg6[%c0_14, %c0_15] : memref<1x1xf32, #tpu.memory_space<vmem>>, vector<1x1xf32>
    %51 = vector.broadcast %50 : vector<1x1xf32> to vector<1x128xf32>
    %52 = arith.addf %49, %51 : vector<1x128xf32>
    %c0_16 = arith.constant 0 : index
    %c0_17 = arith.constant 0 : index
    %53 = vector.load %arg7[%c0_16, %c0_17] : memref<1x128xf32, #tpu.memory_space<vmem>>, vector<1x128xf32>
    tpu.vector_store %arg7[%c0_16, %c0_17], %52 {strides = array<i32>} : memref<1x128xf32, #tpu.memory_space<vmem>>, vector<1x128xf32>,
    return
  }
  func.func @transform_0(%arg0: i32) -> (i32, i32) {
    %c0_i32 = arith.constant 0 : i32
    %c0_i32_0 = arith.constant 0 : i32
    return %c0_i32, %arg0 : i32, i32
  }
  func.func @transform_1(%arg0: i32) -> (i32, i32) {
    %c0_i32 = arith.constant 0 : i32
    %c0_i32_0 = arith.constant 0 : i32
    return %c0_i32, %arg0 : i32, i32
  }
  func.func @transform_2(%arg0: i32) -> (i32, i32) {
    %c0_i32 = arith.constant 0 : i32
    %c0_i32_0 = arith.constant 0 : i32
    %c0_i32_1 = arith.constant 0 : i32
    return %c0_i32, %c0_i32_0 : i32, i32
  }
  func.func @transform_3(%arg0: i32) -> (i32, i32) {
    %c0_i32 = arith.constant 0 : i32
    %c0_i32_0 = arith.constant 0 : i32
    %c0_i32_1 = arith.constant 0 : i32
    return %c0_i32, %c0_i32_0 : i32, i32
  }
  func.func @transform_4(%arg0: i32) -> (i32, i32) {
    %c0_i32 = arith.constant 0 : i32
    %c0_i32_0 = arith.constant 0 : i32
    %c0_i32_1 = arith.constant 0 : i32
    return %c0_i32, %c0_i32_0 : i32, i32
  }
  func.func @transform_5(%arg0: i32) -> (i32, i32) {
    %c0_i32 = arith.constant 0 : i32
    %c0_i32_0 = arith.constant 0 : i32
    %c0_i32_1 = arith.constant 0 : i32
    return %c0_i32, %c0_i32_0 : i32, i32
  }
  func.func @transform_6(%arg0: i32) -> (i32, i32) {
    %c0_i32 = arith.constant 0 : i32
    %c0_i32_0 = arith.constant 0 : i32
    return %c0_i32, %arg0 : i32, i32
  }
}

</mosaic_0001>

<bundles_post_ra>
// kernel: tpu_custom_call.1
= control target key start
LH: loop header
LB: loop body
LE: loop exit
PB: predicated region body
PF: predicated region fallthrough
CT: control target
= control target key end

     0   :  { %s1145_s0 = inlined_call_operand.vmem [shape: f32[4,128], index: 0, kind: input, shape index: {}]   ;;  %s1146_s1 = inlined_call_operand.vmem [shape: f32[32,128], index: 1, kind: input, shape index: {}]   ;;  %s1147_s2 = inlined_call_operand.vmem [shape: f32[224,32], index: 2, kind: input, shape index: {}]   ;;  %s1148_s3 = inlined_call_operand.vmem [shape: f32[224,1], index: 3, kind: input, shape index: {}]   ;;  %s1149_s4 = inlined_call_operand.vmem [shape: f32[32,1], index: 4, kind: input, shape index: {}]   ;;  %s1150_s5 = inlined_call_operand.<no memory space> [shape: f32[1,1], index: 5, kind: input, shape index: {}]   ;;  %s1151_s6 = inlined_call_operand.hbm [shape: f32[1,128], index: 6, kind: output, shape index: {}]  }
   0x1   :  { %v11_v0 = vstv %s1150_s5 }
   0x2   :  { %12 = vst [vmem:[#allocation2] sm:$0x1] %v11_v0 }
   0x3   :  { %v30_v1 = vld [vmem:[%s1146_s1 + $0x18] sm:$0xff]  ;;  %v29_v2 = vld [vmem:[%s1146_s1 + $0x10] sm:$0xff]  ;;  %v28_v3 = vld [vmem:[%s1146_s1 + $0x8] sm:$0xff]  ;;  %v840_v5 = vmov 0   ;;  %vm227_vm0 = vcmask 261120  }
   0x4   :  { %748 = vmatprep.subr.mxu0 %v30_v1  ;;  %798 = vmatprep.subr.mxu1 %v30_v1  ;;  %v59_v4 = vld [vmem:[%s1148_s3] sm:$0xff]  ;;  %v45_v8 = vld [vmem:[%s1147_s2 + $0x70] sm:$0xff]  ;;  %v32_v9 = vld [vmem:[%s1147_s2 + $0x8] sm:$0xff] }
   0x5   :  { %749 = vmatpush3.msra.mxu0 %v30_v1  ;;  %802 = vmatpush3.msra.mxu1 %v30_v1  ;;  %v27_v6 = vld [vmem:[%s1146_s1] sm:$0xff]  ;;  %v46_v10 = vld [vmem:[%s1147_s2 + $0x78] sm:$0xff]  ;;  %v60_v11 = vld [vmem:[%s1148_s3 + $0x8] sm:$0xff] }
   0x6   :  { %750 = vmatprep.subr.mxu0 %v29_v2  ;;  %799 = vmatprep.subr.mxu1 %v29_v2  ;;  %v31_v7 = vld [vmem:[%s1147_s2] sm:$0xff]  ;;  %v61_v12 = vld [vmem:[%s1148_s3 + $0x10] sm:$0xff]  ;;  %v34_v15 = vld [vmem:[%s1147_s2 + $0x18] sm:$0xff] }
   0x7   :  { %751 = vmatpush3.msra.mxu0 %v29_v2  ;;  %803 = vmatpush3.msra.mxu1 %v29_v2  ;;  %v33_v13 = vld [vmem:[%s1147_s2 + $0x10] sm:$0xff]  ;;  %v47_v14 = vld [vmem:[%s1147_s2 + $0x80] sm:$0xff]  ;;  %v48_v16 = vld [vmem:[%s1147_s2 + $0x88] sm:$0xff] }
   0x8   :  { %808 = vset.pattern.permute.xlu0 %v840_v5  ;;  %752 = vmatprep.subr.mxu0 %v28_v3  ;;  %v64_v17 = vld [vmem:[%s1148_s3 + $0x28] sm:$0xff]  ;;  %v35_v18 = vld [vmem:[%s1147_s2 + $0x20] sm:$0xff]  ;;  %v49_v20 = vld [vmem:[%s1147_s2 + $0x90] sm:$0xff] }
   0x9   :  { %800 = vmatprep.subr.mxu1 %v28_v3  ;;  %89 = vperm.xlu0 %808, %v59_v4   ;;  %v63_v19 = vld [vmem:[%s1148_s3 + $0x20] sm:$0xff]  ;;  %v36_v21 = vld [vmem:[%s1147_s2 + $0x28] sm:$0xff]  ;;  %v50_v22 = vld [vmem:[%s1147_s2 + $0x98] sm:$0xff] }
   0xa   :  { %753 = vmatpush3.msra.mxu0 %v28_v3  ;;  %804 = vmatpush3.msra.mxu1 %v28_v3  ;;  %v65_v23 = vld [vmem:[%s1148_s3 + $0x30] sm:$0xff]  ;;  %v62_v25 = vld [vmem:[%s1148_s3 + $0x18] sm:$0xff]  ;;  %v51_v26 = vld [vmem:[%s1147_s2 + $0xa0] sm:$0xff] }
   0xb   :  { %754 = vmatprep.subr.mxu0 %v27_v6  ;;  %801 = vmatprep.subr.mxu1 %v27_v6  ;;  %v37_v24 = vld [vmem:[%s1147_s2 + $0x30] sm:$0xff]  ;;  %v38_v27 = vld [vmem:[%s1147_s2 + $0x38] sm:$0xff]  ;;  %v52_v28 = vld [vmem:[%s1147_s2 + $0xa8] sm:$0xff] }
   0xc   :  { %755 = vmatpush3.msra.mxu0 %v27_v6  ;;  %805 = vmatpush3.msra.mxu1 %v27_v6  ;;  %v68_v29 = vld [vmem:[%s1148_s3 + $0x48] sm:$0xff]  ;;  %v39_v30 = vld [vmem:[%s1147_s2 + $0x40] sm:$0xff] }
   0xd   :  { %756 = vmatprep.mubr.msk.f32.mxu0 %vm227_vm0, %v31_v7  ;;  %777 = vmatprep.mubr.msk.f32.mxu1 %vm227_vm0, %v45_v8 }
   0xe   :  { %757 = vmatmul.mubr.msk.f32.vlgmr.msra.gmra.mxu0 %vm227_vm0, %v32_v9  ;;  %778 = vmatmul.mubr.msk.f32.vlgmr.msra.gmra.mxu1 %vm227_vm0, %v46_v10 }
   0xf   :  { %94 = vperm.xlu0 %808, %v60_v11   ;;  %809 = vset.pattern.permute.xlu1 %v840_v5 }
  0x10   :  { %99 = vperm.xlu1 %809, %v61_v12   ;;  %759 = vmatprep.mubr.msk.f32.mxu0 %vm227_vm0, %v33_v13 }
  0x11   :  { %780 = vmatprep.mubr.msk.f32.mxu1 %vm227_vm0, %v47_v14 }
  0x12   :  { %760 = vmatmul.mubr.msk.f32.gmra.mxu0 %vm227_vm0, %v34_v15  ;;  %781 = vmatmul.mubr.msk.f32.gmra.mxu1 %vm227_vm0, %v48_v16 }
  0x13   :  { %114 = vperm.xlu0 %808, %v64_v17   ;;  %762 = vmatprep.mubr.msk.f32.mxu0 %vm227_vm0, %v35_v18 }
  0x14   :  { %109 = vperm.xlu1 %809, %v63_v19   ;;  %783 = vmatprep.mubr.msk.f32.mxu1 %vm227_vm0, %v49_v20 }
  0x16   :  { %763 = vmatmul.mubr.msk.f32.gmra.mxu0 %vm227_vm0, %v36_v21  ;;  %784 = vmatmul.mubr.msk.f32.gmra.mxu1 %vm227_vm0, %v50_v22 }
  0x17   :  { %119 = vperm.xlu0 %808, %v65_v23   ;;  %765 = vmatprep.mubr.msk.f32.mxu0 %vm227_vm0, %v37_v24 }
  0x18   :  { %104 = vperm.xlu1 %809, %v62_v25   ;;  %786 = vmatprep.mubr.msk.f32.mxu1 %vm227_vm0, %v51_v26 }
  0x19   :  { %13 = vsyncpa [#allocation4], 0  ;;  %v67_v31 = vld [vmem:[%s1148_s3 + $0x40] sm:$0xff]  ;;  %v53_v32 = vld [vmem:[%s1147_s2 + $0xb0] sm:$0xff]  ;;  %v541_v25 = vlaneseq }
  0x1a   :  { %766 = vmatmul.mubr.msk.f32.gmra.mxu0 %vm227_vm0, %v38_v27  ;;  %787 = vmatmul.mubr.msk.f32.gmra.mxu1 %vm227_vm0, %v52_v28  ;;  %v40_v33 = vld [vmem:[%s1147_s2 + $0x48] sm:$0xff]  ;;  %v54_v34 = vld [vmem:[%s1147_s2 + $0xb8] sm:$0xff]  ;;  %v41_v36 = vld [vmem:[%s1147_s2 + $0x50] sm:$0xff] }
  0x1b   :  { %134 = vperm.xlu0 %808, %v68_v29   ;;  %768 = vmatprep.mubr.msk.f32.mxu0 %vm227_vm0, %v39_v30  ;;  %v76_v35 = vld [vmem:[%s1148_s3 + $0x88] sm:$0xff]  ;;  %v75_v37 = vld [vmem:[%s1148_s3 + $0x80] sm:$0xff]  ;;  %v42_v39 = vld [vmem:[%s1147_s2 + $0x58] sm:$0xff]  ;;  %v1110_v30 = vshrl.u32 %v541_v25, 7 }
  0x1c   :  { %129 = vperm.xlu1 %809, %v67_v31   ;;  %789 = vmatprep.mubr.msk.f32.mxu1 %vm227_vm0, %v53_v32  ;;  %v55_v38 = vld [vmem:[%s1147_s2 + $0xc0] sm:$0xff]  ;;  %v56_v40 = vld [vmem:[%s1147_s2 + $0xc8] sm:$0xff]  ;;  %v69_v41 = vld [vmem:[%s1148_s3 + $0x50] sm:$0xff] }
  0x1d   :  { %v43_v42 = vld [vmem:[%s1147_s2 + $0x60] sm:$0xff]  ;;  %v66_v43 = vld [vmem:[%s1148_s3 + $0x38] sm:$0xff]  ;;  %v57_v44 = vld [vmem:[%s1147_s2 + $0xd0] sm:$0xff] }
  0x1e   :  { %769 = vmatmul.mubr.msk.f32.gmra.mxu0 %vm227_vm0, %v40_v33  ;;  %790 = vmatmul.mubr.msk.f32.gmra.mxu1 %vm227_vm0, %v54_v34  ;;  %v44_v45 = vld [vmem:[%s1147_s2 + $0x68] sm:$0xff]  ;;  %v58_v46 = vld [vmem:[%s1147_s2 + $0xd8] sm:$0xff]  ;;  %v71_v48 = vld [vmem:[%s1148_s3 + $0x60] sm:$0xff] }
  0x1f   :  { %174 = vperm.xlu0 %808, %v76_v35   ;;  %771 = vmatprep.mubr.msk.f32.mxu0 %vm227_vm0, %v41_v36  ;;  %v72_v47 = vld [vmem:[%s1148_s3 + $0x68] sm:$0xff]  ;;  %v70_v49 = vld [vmem:[%s1148_s3 + $0x58] sm:$0xff]  ;;  %v77_v50 = vld [vmem:[%s1148_s3 + $0x90] sm:$0xff]  ;;  %v579_v36 = vsub.s32 3, %v1110_v30 }
  0x20   :  { %169 = vperm.xlu1 %809, %v75_v37   ;;  %792 = vmatprep.mubr.msk.f32.mxu1 %vm227_vm0, %v55_v38  ;;  %v78_v51 = vld [vmem:[%s1148_s3 + $0x98] sm:$0xff]  ;;  %v73_v52 = vld [vmem:[%s1148_s3 + $0x70] sm:$0xff]  ;;  %v79_v53 = vld [vmem:[%s1148_s3 + $0xa0] sm:$0xff]  ;;  %v555_v38 = vsub.s32 1, %v1110_v30 }
  0x21   :  { %v74_v54 = vld [vmem:[%s1148_s3 + $0x78] sm:$0xff]  ;;  %v83_v55 = vld [vmem:[%s1148_s3 + $0xc0] sm:$0xff]  ;;  %v80_v56 = vld [vmem:[%s1148_s3 + $0xa8] sm:$0xff] }
  0x22   :  { %772 = vmatmul.mubr.msk.f32.gmra.mxu0 %vm227_vm0, %v42_v39  ;;  %793 = vmatmul.mubr.msk.f32.gmra.mxu1 %vm227_vm0, %v56_v40  ;;  %v81_v57 = vld [vmem:[%s1148_s3 + $0xb0] sm:$0xff]  ;;  %v84_v58 = vld [vmem:[%s1148_s3 + $0xc8] sm:$0xff]  ;;  %v82_v59 = vld [vmem:[%s1148_s3 + $0xb8] sm:$0xff] }
  0x23   :  { %139 = vperm.xlu0 %808, %v69_v41   ;;  %774 = vmatprep.mubr.msk.f32.mxu0 %vm227_vm0, %v43_v42  ;;  %v85_v60 = vld [vmem:[%s1148_s3 + $0xd0] sm:$0xff]  ;;  %v617_v61 = vld [vmem:[%s1149_s4] sm:$0xff]  ;;  %v86_v62 = vld [vmem:[%s1148_s3 + $0xd8] sm:$0xff]  ;;  %v567_v41 = vsub.s32 2, %v1110_v30  ;;  %v543_v42 = vsub.s32 0, %v1110_v30 }
  0x24   :  { %124 = vperm.xlu1 %809, %v66_v43   ;;  %795 = vmatprep.mubr.msk.f32.mxu1 %vm227_vm0, %v57_v44  ;;  %v619_v63 = vld [vmem:[%s1149_s4 + $0x10] sm:$0xff]  ;;  %v618_v0 = vld [vmem:[%s1149_s4 + $0x8] sm:$0xff]  ;;  %v658_v1 = vld [vmem:[#allocation2] sm:$0x1] }
  0x25   :  { %v620_v2 = vld [vmem:[%s1149_s4 + $0x18] sm:$0xff]  ;;  %v26_v35 = vld [vmem:[%s1145_s0] sm:$0xf]  ;;  %s841_s0 = smov [#allocation3]  }
  0x26   :  { %775 = vmatmul.mubr.msk.f32.gmra.mxu0 %vm227_vm0, %v44_v45  ;;  %796 = vmatmul.mubr.msk.f32.gmra.mxu1 %vm227_vm0, %v58_v46  ;;  %s676_s19 = sshll.u32 %s841_s0, 4  ;;  %s677_s19 = int_to_ptr.vmem [resolvable:$true] %s676_s19 }
  0x27   :  { %154 = vperm.xlu0 %808, %v72_v47   ;;  %s818_s20 = scalar_lea.vmem %s677_s19, 16  ;;  %s822_s21 = scalar_lea.vmem %s677_s19, 32 }
  0x28   :  { %149 = vperm.xlu1 %809, %v71_v48   ;;  %v544_v48 = vrot.slane %v26_v35, %v543_v42  ;;  %p819_p0 = scmp.ne.s32.totalorder %s677_s19, %s818_s20  ;;  %p823_p1 = scmp.lt.s32.totalorder %s677_s19, %s677_s19 }
  0x29   :  { %p824_p2 = scmp.lt.s32.totalorder %s822_s21, %s818_s20 }
  0x2b   :  { %144 = vperm.xlu0 %808, %v70_v49   ;;  %p825_p3 = por %p824_p2, %p823_p1 }
  0x2c   :  { %179 = vperm.xlu1 %809, %v77_v50  }
  0x2d   :  { %p826_p4 = pnand %p825_p3, %p819_p0 }
  0x2f   :  { %184 = vperm.xlu0 %808, %v78_v51  }
  0x30   :  { %159 = vperm.xlu1 %809, %v73_v52   ;;  %v1121_v52 = vrot.slane %v26_v35, %v579_v36 }
  0x33   :  { %189 = vperm.xlu0 %808, %v79_v53  }
  0x34   :  { %164 = vperm.xlu1 %809, %v74_v54   ;;  %v556_v54 = vrot.slane %v26_v35, %v555_v38 }
  0x37   :  { %209 = vperm.xlu0 %808, %v83_v55  }
  0x38   :  { %194 = vperm.xlu1 %809, %v80_v56  }
  0x3b   :  { %199 = vperm.xlu0 %808, %v81_v57   ;;  %v568_v57 = vrot.slane %v26_v35, %v567_v41 }
  0x3c   :  { %214 = vperm.xlu1 %809, %v84_v58  }
  0x3f   :  { %204 = vperm.xlu0 %808, %v82_v59  }
  0x40   :  { %219 = vperm.xlu1 %809, %v85_v60  }
  0x43   :  { %623 = vperm.xlu0 %808, %v617_v61  }
  0x44   :  { %224 = vperm.xlu1 %809, %v86_v62  }
  0x47   :  { %633 = vperm.xlu0 %808, %v619_v63  }
  0x48   :  { %628 = vperm.xlu1 %809, %v618_v0  }
  0x4b   :  { %661 = vperm.xlu0 %808, %v658_v1  }
  0x4c   :  { %638 = vperm.xlu1 %809, %v620_v2  }
  0x84   :  { %v90_v4 = vpop.permute.xlu0 %89 }
  0x8a   :  { %v95_v6 = vpop.permute.xlu0 %94 }
  0x8b   :  { %v100_v3 = vpop.permute.xlu1 %99 }
  0x8e   :  { %v115_v8 = vpop.permute.xlu0 %114 }
  0x8f   :  { %v110_v5 = vpop.permute.xlu1 %109 }
  0x92   :  { %v120_v10 = vpop.permute.xlu0 %119 }
  0x93   :  { %v105_v7 = vpop.permute.xlu1 %104 }
  0x96   :  { %v135_v12 = vpop.permute.xlu0 %134 }
  0x97   :  { %v1100_v9 = vpop.permute.xlu1 %129 }
  0x9a   :  { %v175_v14 = vpop.permute.xlu0 %174 }
  0x9b   :  { %v1102_v11 = vpop.permute.xlu1 %169 }
  0x9e   :  { %v1106_v16 = vpop.permute.xlu0 %139 }
  0x9f   :  { %v125_v13 = vpop.permute.xlu1 %124 }
  0xa2   :  { %v1108_v24 = vpop.permute.xlu0 %154 }
  0xa3   :  { %v1104_v15 = vpop.permute.xlu1 %149 }
  0xa6   :  { %v145_v32 = vpop.permute.xlu0 %144 }
  0xa7   :  { %v180_v21 = vpop.permute.xlu1 %179 }
  0xaa   :  { %v185_v62 = vpop.permute.xlu0 %184 }
  0xab   :  { %v160_v29 = vpop.permute.xlu1 %159 }
  0xaf   :  { %v165_v47 = vpop.permute.xlu1 %164 }
  0xce   :  { %v758_v17 = vpop.f32.mrf.mxu0  ;;  %v779_v18 = vpop.f32.mrf.mxu1 }
  0xcf   :  { %v384_v33 = vadd.f32 %v758_v17, %v95_v6  ;;  %v454_v58 = vadd.f32 %v779_v18, %v165_v47 }
  0xd0   :  { %v378_v19 = vpop.f32.mrf.mxu0  ;;  %v448_v20 = vpop.f32.mrf.mxu1 }
  0xd1   :  { %v379_v44 = vadd.f32 %v378_v19, %v90_v4  ;;  %v518_v49 = vand.u32 2147483647, %v384_v33  ;;  %v449_v59 = vadd.f32 %v448_v20, %v160_v29 }
  0xd2   :  { %v761_v22 = vpop.f32.mrf.mxu0  ;;  %v782_v23 = vpop.f32.mrf.mxu1 }
  0xd3   :  { %v394_v34 = vadd.f32 %v761_v22, %v105_v7  ;;  %v517_v63 = vand.u32 2147483647, %v379_v44  ;;  %v546_v4 = vmul.f32 %v544_v48, %v518_v49  ;;  %v464_v7 = vadd.f32 %v782_v23, %v175_v14 }
  0xd4   :  { %v388_v26 = vpop.f32.mrf.mxu0  ;;  %v458_v27 = vpop.f32.mrf.mxu1  ;;  %v532_v22 = vand.u32 2147483647, %v454_v58 }
  0xd5   :  { %v389_v37 = vadd.f32 %v388_v26, %v100_v3  ;;  %v520_v50 = vand.u32 2147483647, %v394_v34  ;;  %v459_v14 = vadd.f32 %v458_v27, %v1102_v11  ;;  %v550_v35 = vadd.f32 %v546_v4, %v464_v7 }
  0xd6   :  { %v764_v28 = vpop.f32.mrf.mxu0  ;;  %v785_v39 = vpop.f32.mrf.mxu1  ;;  %v584_v44 = vmul.f32 %v1121_v52, %v532_v22 }
  0xd7   :  { %v404_v45 = vadd.f32 %v764_v28, %v115_v8  ;;  %v519_v53 = vand.u32 2147483647, %v389_v37  ;;  %v548_v6 = vmul.f32 %v544_v48, %v520_v50  ;;  %v474_v8 = vadd.f32 %v785_v39, %v185_v62  ;;  %v190_v50 = vpop.permute.xlu0 %189 }
  0xd8   :  { %v398_v31 = vpop.f32.mrf.mxu0  ;;  %v468_v55 = vpop.f32.mrf.mxu1  ;;  %v545_v28 = vmul.f32 %v544_v48, %v517_v63 }
  0xd9   :  { %v522_v0 = vand.u32 2147483647, %v404_v45  ;;  %v399_v1 = vadd.f32 %v398_v31, %v110_v5  ;;  %v552_v23 = vadd.f32 %v548_v6, %v474_v8 }
  0xda   :  { %v767_v40 = vpop.f32.mrf.mxu0  ;;  %v1123_v17 = vpop.f32.mrf.mxu1 }
  0xdb   :  { %v414_v43 = vadd.f32 %v767_v40, %v125_v13  ;;  %v469_v13 = vadd.f32 %v468_v55, %v180_v21  ;;  %v558_v5 = vmul.f32 %v556_v54, %v522_v0  ;;  %v521_v29 = vand.u32 2147483647, %v399_v1 }
  0xdc   :  { %v408_v46 = vpop.f32.mrf.mxu0  ;;  %v478_v37 = vpop.f32.mrf.mxu1 }
  0xdd   :  { %v409_v51 = vadd.f32 %v408_v46, %v120_v10  ;;  %v524_v60 = vand.u32 2147483647, %v414_v43  ;;  %v547_v10 = vmul.f32 %v544_v48, %v519_v53  ;;  %v562_v45 = vadd.f32 %v558_v5, %v550_v35 }
  0xde   :  { %v770_v56 = vpop.f32.mrf.mxu0  ;;  %v557_v46 = vmul.f32 %v556_v54, %v521_v29  ;;  %v549_v53 = vadd.f32 %v545_v28, %v459_v14  ;;  %v479_v29 = vadd.f32 %v478_v37, %v190_v50 }
  0xdf   :  { %v424_v61 = vadd.f32 %v770_v56, %v135_v12  ;;  %v523_v2 = vand.u32 2147483647, %v409_v51  ;;  %v531_v12 = vand.u32 2147483647, %v449_v59  ;;  %v560_v25 = vmul.f32 %v556_v54, %v524_v60  ;;  %v791_v56 = vpop.f32.mrf.mxu1 }
  0xe0   :  { %v418_v3 = vpop.f32.mrf.mxu0  ;;  %v551_v36 = vadd.f32 %v547_v10, %v469_v13  ;;  %v561_v62 = vadd.f32 %v557_v46, %v549_v53 }
  0xe1   :  { %v526_v19 = vand.u32 2147483647, %v424_v61  ;;  %v419_v18 = vadd.f32 %v418_v3, %v1100_v9  ;;  %v559_v31 = vmul.f32 %v556_v54, %v523_v2  ;;  %v564_v40 = vadd.f32 %v560_v25, %v552_v23  ;;  %v195_v61 = vpop.permute.xlu1 %194  ;;  %v488_v2 = vpop.f32.mrf.mxu1 }
  0xe2   :  { %v773_v20 = vpop.f32.mrf.mxu0  ;;  %v583_v51 = vmul.f32 %v1121_v52, %v531_v12  ;;  %v484_v5 = vadd.f32 %v1123_v17, %v195_v61 }
  0xe3   :  { %v434_v26 = vadd.f32 %v773_v20, %v145_v32  ;;  %v570_v9 = vmul.f32 %v568_v57, %v526_v19  ;;  %v525_v38 = vand.u32 2147483647, %v419_v18  ;;  %v563_v11 = vadd.f32 %v559_v31, %v551_v36  ;;  %v794_v18 = vpop.f32.mrf.mxu1 }
  0xe4   :  { %v428_v33 = vpop.f32.mrf.mxu0 }
  0xe5   :  { %v528_v34 = vand.u32 2147483647, %v434_v26  ;;  %v429_v21 = vadd.f32 %v428_v33, %v1106_v16  ;;  %v574_v55 = vadd.f32 %v570_v9, %v562_v45  ;;  %v569_v58 = vmul.f32 %v568_v57, %v525_v38  ;;  %v215_v19 = vpop.permute.xlu1 %214  ;;  %v498_v25 = vpop.f32.mrf.mxu1 }
  0xe6   :  { %v776_v39 = vpop.f32.mrf.mxu0  ;;  %v504_v33 = vadd.f32 %v794_v18, %v215_v19  ;;  %v534_v9 = vand.u32 2147483647, %v484_v5  ;;  %v533_v38 = vand.u32 2147483647, %v479_v29 }
  0xe7   :  { %v572_v41 = vmul.f32 %v568_v57, %v528_v34  ;;  %v527_v32 = vand.u32 2147483647, %v429_v21  ;;  %v444_v43 = vadd.f32 %v776_v39, %v1108_v24  ;;  %v797_v28 = vpop.f32.mrf.mxu1 }
  0xe8   :  { %v438_v27 = vpop.f32.mrf.mxu0 }
  0xe9   :  { %v576_v47 = vadd.f32 %v572_v41, %v564_v40  ;;  %v571_v48 = vmul.f32 %v568_v57, %v527_v32  ;;  %v530_v16 = vand.u32 2147483647, %v444_v43  ;;  %v439_v49 = vadd.f32 %v438_v27, %v1104_v15  ;;  %v210_v57 = vpop.permute.xlu0 %209  ;;  %v220_v26 = vpop.permute.xlu1 %219 }
  0xea   :  { %v573_v15 = vadd.f32 %v569_v58, %v561_v62  ;;  %v508_v14 = vpop.f32.mrf.mxu1  ;;  %v499_v34 = vadd.f32 %v498_v25, %v210_v57  ;;  %v538_v43 = vmax.f32 %v504_v33, 0.0 }
  0xeb   :  { %v1132_v59 = vadd.f32 %v584_v44, %v576_v47  ;;  %v575_v24 = vadd.f32 %v571_v48, %v563_v11  ;;  %v582_v60 = vmul.f32 %v1121_v52, %v530_v16  ;;  %v529_v54 = vand.u32 2147483647, %v439_v49 }
  0xec   :  { %v509_v39 = vadd.f32 %v508_v14, %v220_v26  ;;  %v537_v17 = vmax.f32 %v499_v34, 0.0 }
  0xed   :  { %v596_v63 = vmin.f32 %v1132_v59, 0.0  ;;  %v587_v0 = vadd.f32 %v583_v51, %v575_v24  ;;  %v586_v1 = vadd.f32 %v582_v60, %v574_v55  ;;  %v581_v3 = vmul.f32 %v1121_v52, %v529_v54  ;;  %v200_v12 = vpop.permute.xlu0 %199  ;;  %v225_v31 = vpop.permute.xlu1 %224 }
  0xee   :  { %v489_v35 = vadd.f32 %v488_v2, %v200_v12  ;;  %v514_v37 = vadd.f32 %v797_v28, %v225_v31  ;;  %vm592_vm3 = vcmp.gt.f32.partialorder %v1132_v59, 0.0  ;;  %v539_v50 = vmax.f32 %v509_v39, 0.0 }
  0xef   :  { %v603_v4 = vmul.f32 1.442695, %v596_v63  ;;  %v595_v6 = vmin.f32 %v587_v0, 0.0  ;;  %v594_v7 = vmin.f32 %v586_v1, 0.0  ;;  %v585_v8 = vadd.f32 %v581_v3, %v573_v15 }
  0xf0   :  { %vm590_vm1 = vcmp.gt.f32.partialorder %v586_v1, 0.0  ;;  %vm591_vm2 = vcmp.gt.f32.partialorder %v587_v0, 0.0  ;;  %v535_v27 = vand.u32 2147483647, %v489_v35  ;;  %v540_v24 = vmax.f32 %v514_v37, 0.0 }
  0xf1   :  { %v601_v10 = vmul.f32 1.442695, %v595_v6  ;;  %v599_v13 = vmul.f32 1.442695, %v594_v7  ;;  %810 = vpow2.f32 %v603_v4  ;;  %v593_v20 = vmin.f32 %v585_v8, 0.0  ;;  %v205_v52 = vpop.permute.xlu0 %204  ;;  %v629_v11 = vpop.permute.xlu1 %628 }
  0xf2   :  { %v494_v32 = vadd.f32 %v791_v56, %v205_v52  ;;  %vm589_vm4 = vcmp.gt.f32.partialorder %v585_v8, 0.0  ;;  %v642_v53 = vmul.f32 %v629_v11, %v538_v43 }
  0xf3   :  { %812 = vpow2.f32 %v601_v10  ;;  %v597_v22 = vmul.f32 1.442695, %v593_v20 }
  0xf4   :  { %814 = vpow2.f32 %v599_v13  ;;  %v536_v51 = vand.u32 2147483647, %v494_v32 }
  0xf5   :  { %816 = vpow2.f32 %v597_v22  ;;  %v624_v41 = vpop.permute.xlu0 %623 }
  0xf6   :  { %v641_v58 = vmul.f32 %v624_v41, %v537_v17 }
  0xf9   :  { %v634_v61 = vpop.permute.xlu0 %633 }
  0xfa   :  { %v643_v63 = vmul.f32 %v634_v61, %v539_v50 }
  0xfd   :  { %v662_v19 = vpop.permute.xlu0 %661 }
  0xfe   :  { %v811_v23 = vpop.eup %810  ;;  %v667_v20 = vrot.slane %v662_v19, %v543_v42 }
  0xff   :  { %v715_v45 = vadd.f32 -1.0, %v811_v23 }
 0x100   :  { %v813_v21 = vpop.eup %812 }
 0x101   :  { %v815_v36 = vpop.eup %814  ;;  %v714_v40 = vadd.f32 -1.0, %v813_v21  ;;  %v612_v55 = vsel %vm592_vm3, %v1132_v59, %v715_v45 }
 0x102   :  { %v713_v44 = vadd.f32 -1.0, %v815_v36  ;;  %v817_v46 = vpop.eup %816  ;;  %v616_v62 = vmul.f32 %v612_v55, %v536_v51 }
 0x103   :  { %v712_v48 = vadd.f32 -1.0, %v817_v46  ;;  %v611_v16 = vsel %vm591_vm2, %v587_v0, %v714_v40  ;;  %v639_v0 = vpop.permute.xlu1 %638 }
 0x104   :  { %v610_v47 = vsel %vm590_vm1, %v586_v1, %v713_v44  ;;  %v615_v54 = vmul.f32 %v611_v16, %v535_v27  ;;  %v644_v2 = vmul.f32 %v639_v0, %v540_v24 }
 0x105   :  { %v614_v49 = vmul.f32 %v610_v47, %v534_v9  ;;  %v609_v56 = vsel %vm589_vm4, %v585_v8, %v712_v48 }
 0x106   :  { %v613_v60 = vmul.f32 %v609_v56, %v533_v38  ;;  %v647_v3 = vadd.f32 %v643_v63, %v615_v54  ;;  %v648_v6 = vadd.f32 %v644_v2, %v616_v62 }
 0x107   :  { %v646_v15 = vadd.f32 %v642_v53, %v614_v49 }
 0x108   :  { %v645_v1 = vadd.f32 %v641_v58, %v613_v60 }
 0x10a   :  { %v649_v4 = vadd.f32 %v646_v15, %v645_v1 }
 0x10c   :  { %v650_v7 = vadd.f32 %v649_v4, %v647_v3 }
 0x10e   :  { %v651_v57 = vadd.f32 %v650_v7, %v648_v6 }
 0x110   :  { %v652_v10 = vrot.slane %v651_v57, 4 }
 0x112   :  { %v653_v13 = vadd.f32 %v652_v10, %v651_v57 }
 0x114   :  { %v654_v59 = vrot.slane %v653_v13, 2 }
 0x116   :  { %v655_v8 = vadd.f32 %v654_v59, %v653_v13 }
 0x118   :  { %v656_v18 = vrot.slane %v655_v8, 1 }
 0x11a   :  { %v657_v22 = vadd.f32 %v656_v18, %v655_v8 }
 0x11c   :  { %v668_v12 = vadd.f32 %v667_v20, %v657_v22 }
 0x11e   :  { %669 = vst [vmem:[#allocation3] sm:$0x1] %v668_v12 }
 0x11f   :  { %829 = shalt.err (!%p826_p4)
}
 0x120   :  { %679 = dma.vmem_to_hbm [thread:$0]  %s677_s19, 16, %s1151_s6, [#allocation4]  }
 0x121   :  { %838 = dma.done.wait [#allocation4], 16  }
 0x122   :  { %839 = vsyncadd [#allocation4], 4294967280 }
 0x123   :  { %683 = vsyncpa [#allocation4], 1 }

</bundles_post_ra>
